<compile_context>
chip_gen: v5e
topology: v5e:2x2
jax: 0.10.0
libtpu: 0.0.40
codegen_flags: <defaults>
</compile_context>

<pallas_src>
import math
from functools import partial

import numpy as np
import jax
import jax.numpy as jnp
from jax.experimental import pallas as pl
from jax.experimental.pallas import tpu as pltpu

# Problem sizes fixed by the PyTorch module (input = torch.rand([1, 3, 10, 10]))
C_IN, H_IN, W_IN = 3, 10, 10
KH = KW = 3
OH, OW = H_IN - KH + 1, W_IN - KW + 1      # 8, 8
P = OH * OW                                 # 64 output positions
HW = H_IN * W_IN                            # 100 input pixels
C_OFF = 2 * KH * KW                         # 18 offset channels (conv1 out)
C_OUT = 3

K_LIVE = C_IN * HW                          # 300 live contraction rows
K_PAD = 304                                 # sublane-aligned (multiple of 16 for bf16)
N_LIVE = C_OUT * P                          # 192 live output lanes
N_PAD = 256                                 # 2 * 128, lane-dense output


# ----------------------------------------------------------------------------
# Pallas kernel: entire per-call forward = one bf16 MXU matmul + f32 bias add.
#   x_ref : [1, K_PAD]      bf16  flattened x (zero-padded K)
#   m_ref : [K_PAD, N_PAD]  bf16  fused sampling x weight matrix
#   b_ref : [1, N_PAD]      f32   bias vector (broadcast over P per channel)
#   out   : [1, N_PAD]      f32   out[0, co*P + p]; lanes >= N_LIVE are padding
# ----------------------------------------------------------------------------
def fused_matmul_kernel(x_ref, m_ref, b_ref, out_ref):
    acc = jnp.dot(x_ref[...], m_ref[...], preferred_element_type=jnp.float32)
    out_ref[...] = acc + b_ref[...]


# ----------------------------------------------------------------------------
# Init-time precompute (plain JAX, x-independent, runs once).
# ----------------------------------------------------------------------------
def _im2col(img):
    """img [C, H, W] -> [C*KH*KW, OH*OW], ordering ci*9 + ki*3 + kj."""
    cols = []
    for ci in range(img.shape[0]):
        for ki in range(KH):
            for kj in range(KW):
                cols.append(img[ci, ki:ki + OH, kj:kj + OW].reshape(-1))
    return jnp.stack(cols, axis=0)


def build_fused_matrix(input_const, w1, b1, w2, b2):
    """Fold conv1(input_const) -> offsets -> bilinear sampling -> conv2 weights
    into a bf16 [K_PAD, N_PAD] matrix and an f32 [1, N_PAD] bias vector."""
    f32 = jnp.float32

    # conv1 offset generator on the constant input:  [C_OFF, P]
    patches = _im2col(input_const[0]).astype(f32)                    # [27, 64]
    w1f = w1.reshape(C_OFF, C_IN * KH * KW).astype(f32)              # [18, 27]
    offsets = w1f @ patches + b1.reshape(C_OFF, 1).astype(f32)       # [18, 64]

    # base output-grid / input-pixel coordinates
    p_idx = jnp.arange(P)
    ho = (p_idx // OW).astype(f32)                                   # [P]
    wo = (p_idx % OW).astype(f32)
    q_idx = jnp.arange(HW)
    qy = (q_idx // W_IN).astype(f32)[:, None]                        # [HW, 1]
    qx = (q_idx % W_IN).astype(f32)[:, None]

    # per-tap dense bilinear sampling matrices S_k[q, p] (relu'd distances
    # reproduce torchvision's zero-padded bilinear behavior exactly)
    s_list = []
    for k in range(KH * KW):
        ki, kj = k // KW, k % KW
        py = (ho + float(ki) + offsets[2 * k, :])[None, :]           # [1, P]
        px = (wo + float(kj) + offsets[2 * k + 1, :])[None, :]
        wy = jnp.maximum(0.0, 1.0 - jnp.abs(py - qy))                # [HW, P]
        wx = jnp.maximum(0.0, 1.0 - jnp.abs(px - qx))
        s_list.append(wy * wx)
    s_all = jnp.stack(s_list, axis=0)                                # [9, HW, P]

    # fold DeformConv2d weights:  M[(ci,q), (co,p)] = sum_k w2[co,ci,k]*S_k[q,p]
    w2r = w2.reshape(C_OUT, C_IN, KH * KW).astype(f32)               # [3, 3, 9]
    m = jnp.einsum('ock,kqp->cqop', w2r, s_all)                      # [3,100,3,64]
    m = m.reshape(K_LIVE, N_LIVE)                                    # [300, 192]

    m_pad = jnp.zeros((K_PAD, N_PAD), f32)
    m_pad = m_pad.at[:K_LIVE, :N_LIVE].set(m)
    fused_mat = m_pad.astype(jnp.bfloat16)                           # bf16 weights

    bias_row = jnp.zeros((1, N_PAD), f32)
    bias_row = bias_row.at[0, :N_LIVE].set(jnp.repeat(b2.astype(f32), P))
    return fused_mat, bias_row


# ----------------------------------------------------------------------------
# Per-call wrapper (fully jitted: pad/cast + pallas_call + slice/reshape)
# ----------------------------------------------------------------------------
@partial(jax.jit, static_argnames=())
def model_forward(x, fused_mat, bias_row):
    x_vec = x.reshape(1, K_LIVE).astype(jnp.bfloat16)
    x_pad = jnp.pad(x_vec, ((0, 0), (0, K_PAD - K_LIVE)))            # single pad HLO

    vmem = pl.BlockSpec(memory_space=pltpu.MemorySpace.VMEM)
    out_row = pl.pallas_call(
        fused_matmul_kernel,
        out_shape=jax.ShapeDtypeStruct((1, N_PAD), jnp.float32),
        in_specs=[vmem, vmem, vmem],
        out_specs=vmem,
        compiler_params=pltpu.CompilerParams(vmem_limit_bytes=2 * 1024 * 1024),
        cost_estimate=pl.CostEstimate(
            flops=2 * K_PAD * N_PAD + N_PAD,
            transcendentals=0,
            bytes_accessed=(K_PAD * 2                   # x row (bf16)
                            + K_PAD * N_PAD * 2         # fused matrix (bf16)
                            + N_PAD * 4                 # bias (f32)
                            + N_PAD * 4)),              # output (f32)
    )(x_pad, fused_mat, bias_row)

    return out_row[0, :N_LIVE].reshape(1, C_OUT, OH, OW)


# ----------------------------------------------------------------------------
# Plain numpy reference (Conv2d + torchvision DeformConv2d semantics)
# ----------------------------------------------------------------------------
def reference_forward(x, input_const, w1, b1, w2, b2):
    x = np.asarray(x, np.float64)
    inp = np.asarray(input_const, np.float64)
    w1 = np.asarray(w1, np.float64)
    b1 = np.asarray(b1, np.float64)
    w2 = np.asarray(w2, np.float64)
    b2 = np.asarray(b2, np.float64)

    off = np.zeros((C_OFF, OH, OW), np.float64)
    for co in range(C_OFF):
        for hh in range(OH):
            for ww in range(OW):
                off[co, hh, ww] = (w1[co] * inp[0, :, hh:hh + KH, ww:ww + KW]).sum() + b1[co]

    def bilinear(img, y, xx):
        H, W = img.shape
        if y <= -1 or y >= H or xx <= -1 or xx >= W:
            return 0.0
        y0, x0 = int(np.floor(y)), int(np.floor(xx))
        val = 0.0
        for dy in (0, 1):
            for dx in (0, 1):
                yy, xc = y0 + dy, x0 + dx
                if 0 <= yy < H and 0 <= xc < W:
                    val += (1.0 - abs(y - yy)) * (1.0 - abs(xx - xc)) * img[yy, xc]
        return val

    out = np.zeros((1, C_OUT, OH, OW), np.float64)
    for co in range(C_OUT):
        for hh in range(OH):
            for ww in range(OW):
                acc = b2[co]
                for ci in range(C_IN):
                    for ki in range(KH):
                        for kj in range(KW):
                            k = ki * KW + kj
                            py = hh + ki + off[2 * k, hh, ww]
                            px = ww + kj + off[2 * k + 1, hh, ww]
                            acc += w2[co, ci, ki, kj] * bilinear(x[0, ci], py, px)
                out[0, co, hh, ww] = acc
    return out.astype(np.float32)


if __name__ == "__main__":
    key = jax.random.PRNGKey(0)
    k_in, k_x, k_w1, k_b1, k_w2, k_b2 = jax.random.split(key, 6)
    fan_in = C_IN * KH * KW
    bound = 1.0 / math.sqrt(fan_in)

    # constant `input` from the module (torch.rand([1, 3, 10, 10]))
    input_const = jax.random.uniform(k_in, (1, C_IN, H_IN, W_IN), jnp.float32)
    # forward-pass argument x (must match spatial dims so offsets line up)
    x = jax.random.uniform(k_x, (1, C_IN, H_IN, W_IN), jnp.float32)

    w1 = jax.random.uniform(k_w1, (C_OFF, C_IN, KH, KW), jnp.float32, -bound, bound)
    b1 = jax.random.uniform(k_b1, (C_OFF,), jnp.float32, -bound, bound)
    w2 = jax.random.uniform(k_w2, (C_OUT, C_IN, KH, KW), jnp.float32, -bound, bound)
    b2 = jax.random.uniform(k_b2, (C_OUT,), jnp.float32, -bound, bound)

    # init-time precompute (x-independent): offsets + sampling + weight folding
    fused_mat, bias_row = build_fused_matrix(input_const, w1, b1, w2, b2)
    fused_mat = jax.block_until_ready(fused_mat)
    bias_row = jax.block_until_ready(bias_row)

    # per-call: single jitted Pallas matmul kernel
    out = jax.block_until_ready(model_forward(x, fused_mat, bias_row))
    assert out.shape == (1, C_OUT, OH, OW)

    ref = reference_forward(x, input_const, w1, b1, w2, b2)
    np.testing.assert_allclose(np.asarray(out), ref, atol=2e-2, rtol=2e-2)
    print("KERNEL_OK")
</pallas_src>

<mosaic_0001>
module attributes {stable_mosaic.version = 11 : i64} {
  func.func @fused_matmul_kernel(%arg0: memref<1x304xbf16, #tpu.memory_space<vmem>>, %arg1: memref<304x256xbf16, #tpu.memory_space<vmem>>, %arg2: memref<1x256xf32, #tpu.memory_space<vmem>>, %arg3: memref<1x256xf32, #tpu.memory_space<vmem>>) attributes {dimension_semantics = [], scalar_prefetch = 0 : i64, scratch_operands = 0 : i64, tpu.core_type = #tpu.core_type<tc>} {
    %c0 = arith.constant 0 : index
    %c0_0 = arith.constant 0 : index
    %0 = vector.load %arg0[%c0, %c0_0] : memref<1x304xbf16, #tpu.memory_space<vmem>>, vector<1x304xbf16>
    %c0_1 = arith.constant 0 : index
    %c0_2 = arith.constant 0 : index
    %1 = vector.load %arg1[%c0_1, %c0_2] : memref<304x256xbf16, #tpu.memory_space<vmem>>, vector<304x256xbf16>
    %cst = arith.constant dense<0.000000e+00> : vector<1x256xf32>
    %2 = tpu.matmul %0, %1, %cst {dimension_numbers = #tpu.dot_dimension_numbers<[1], [0], [0], [1], [0, 0, 1, 1], [], []>} : vector<1x304xbf16>, vector<304x256xbf16>, vector<1x256xf32> -> vector<1x256xf32>
    %c0_3 = arith.constant 0 : index
    %c0_4 = arith.constant 0 : index
    %3 = vector.load %arg2[%c0_3, %c0_4] : memref<1x256xf32, #tpu.memory_space<vmem>>, vector<1x256xf32>
    %4 = arith.addf %2, %3 : vector<1x256xf32>
    %c0_5 = arith.constant 0 : index
    %c0_6 = arith.constant 0 : index
    %5 = vector.load %arg3[%c0_5, %c0_6] : memref<1x256xf32, #tpu.memory_space<vmem>>, vector<1x256xf32>
    tpu.vector_store %arg3[%c0_5, %c0_6], %4 {strides = array<i32>} : memref<1x256xf32, #tpu.memory_space<vmem>>, vector<1x256xf32>,
    return
  }
}

</mosaic_0001>

<bundles_post_ra>
// kernel: squeeze.1
= control target key start
LH: loop header
LB: loop body
LE: loop exit
PB: predicated region body
PF: predicated region fallthrough
CT: control target
= control target key end

     0   :  { %s202_s0 = inlined_call_operand.vmem [shape: f32[192], index: 0, kind: input, shape index: {}]   ;;  %s203_s1 = inlined_call_operand.hbm [shape: f32[1,3,8,8], index: 1, kind: output, shape index: {}]  }
   0x1   :  { %v5_v0 = vld [vmem:[%s202_s0] sm:$0x3] }
   0x2   :  { %2 = vsyncpa [#allocation1], 0  ;;  %6 = vst [vmem:[#allocation2] sm:$0x3] %v5_v0  ;;  %s154_s0 = smov 104   ;;  %s155_s8 = smov 120  }
   0x3   :  { %s156_s9 = smov 88   ;;  %s157_s10 = smov 96   ;;  %vm8_vm0 = vcmask 64512  }
   0x4   :  { %s158_s11 = smov 112   ;;  %s159_s12 = smov 80  }
   0x5   :  { %s160_s13 = smov 64   ;;  %s161_s14 = smov 72  }
   0x6   :  { %s162_s15 = smov 56   ;;  %s163_s16 = smov 40  }
   0x7   :  { %s164_s17 = smov 48   ;;  %s165_s18 = smov 32  }
   0x8   :  { %s166_s19 = smov 16   ;;  %s167_s20 = smov 24  }
   0x9   :  { %v22_v1 = vld [vmem:[#allocation2] sm:$0x3]   ;;  %s168_s21 = smov 8   ;;  %s169_s22 = smov [#allocation0]  }
   0xa   :  { %v10_v2 = vld [vmem:[#allocation2] sm:$0x3]   ;;  %23 = vrot.lane.b32.xlu1 %v22_v1, %s154_s0  ;;  %s103_s23 = sshll.u32 %s169_s22, 4  ;;  %s105_s1 = sshll.u32 %s203_s1, 4  ;;  %s104_s23 = int_to_ptr.vmem [resolvable:$true] %s103_s23  ;;  %s106_s1 = int_to_ptr.hbm [resolvable:$true] %s105_s1 }
   0xb   :  { %11 = vrot.lane.b32.xlu0 %v10_v2, %s155_s8  ;;  %v34_v3 = vld [vmem:[#allocation2] sm:$0x3]  }
   0xc   :  { %35 = vrot.lane.b32.xlu2 %v34_v3, %s156_s9  ;;  %v28_v4 = vld [vmem:[#allocation2] sm:$0x3]  }
   0xd   :  { %v16_v5 = vld [vmem:[#allocation2] sm:$0x3]  }
   0xe   :  { %v40_v6 = vld [vmem:[#allocation2] sm:$0x3]  }
   0xf   :  { %v52_v7 = vld [vmem:[#allocation2] sm:$0x1]  }
  0x10   :  { %v46_v8 = vld [vmem:[#allocation2] sm:$0x3]  }
  0x11   :  { %v58_v9 = vld [vmem:[#allocation2] sm:$0x1]  }
  0x12   :  { %29 = vrot.lane.b32.xlu1 %v28_v4, %s157_s10  ;;  %v70_v10 = vld [vmem:[#allocation2] sm:$0x1]  }
  0x13   :  { %17 = vrot.lane.b32.xlu0 %v16_v5, %s158_s11  ;;  %v64_v11 = vld [vmem:[#allocation2] sm:$0x1]  }
  0x14   :  { %41 = vrot.lane.b32.xlu2 %v40_v6, %s159_s12  ;;  %v76_v12 = vld [vmem:[#allocation2] sm:$0x1]  }
  0x15   :  { %v88_v13 = vld [vmem:[#allocation2] sm:$0x1]  }
  0x16   :  { %v82_v14 = vld [vmem:[#allocation2] sm:$0x1]  }
  0x17   :  { %v94_v15 = vld [vmem:[#allocation2] sm:$0x1]  }
  0x18   :  { %v7_v21 = vld [vmem:[#allocation2] sm:$0x3]  }
  0x19   :  { %9 = vst.msk [vmem:[#allocation0] ss:$16 sm:$0x3] %vm8_vm0, %v7_v21  }
  0x1a   :  { %53 = vrot.lane.b32.xlu1 %v52_v7, %s160_s13 }
  0x1b   :  { %47 = vrot.lane.b32.xlu0 %v46_v8, %s161_s14 }
  0x1c   :  { %59 = vrot.lane.b32.xlu2 %v58_v9, %s162_s15 }
  0x22   :  { %71 = vrot.lane.b32.xlu1 %v70_v10, %s163_s16 }
  0x23   :  { %65 = vrot.lane.b32.xlu0 %v64_v11, %s164_s17 }
  0x24   :  { %77 = vrot.lane.b32.xlu2 %v76_v12, %s165_s18 }
  0x2a   :  { %89 = vrot.lane.b32.xlu1 %v88_v13, %s166_s19 }
  0x2b   :  { %83 = vrot.lane.b32.xlu0 %v82_v14, %s167_s20 }
  0x2c   :  { %95 = vrot.lane.b32.xlu2 %v94_v15, %s168_s21 }
  0x66   :  { %v36_v16 = vpop.permute.xlu2 %35  }
  0x67   :  { %39 = vst.msk [vmem:[#allocation0 + $0x5] ss:$16 sm:$0x3] %vm8_vm0, %v36_v16  }
  0x6e   :  { %v42_v17 = vpop.permute.xlu2 %41  }
  0x6f   :  { %45 = vst.msk [vmem:[#allocation0 + $0x6] ss:$16 sm:$0x3] %vm8_vm0, %v42_v17  }
  0x76   :  { %v60_v18 = vpop.permute.xlu2 %59  }
  0x77   :  { %63 = vst.msk [vmem:[#allocation0 + $0x9] sm:$0x1] %vm8_vm0, %v60_v18  }
  0x7c   :  { %v24_v19 = vpop.permute.xlu1 %23  }
  0x7d   :  { %v12_v20 = vpop.permute.xlu0 %11   ;;  %27 = vst.msk [vmem:[#allocation0 + $0x3] ss:$16 sm:$0x3] %vm8_vm0, %v24_v19  }
  0x7e   :  { %15 = vst.msk [vmem:[#allocation0 + $0x1] ss:$16 sm:$0x3] %vm8_vm0, %v12_v20   ;;  %v78_v22 = vpop.permute.xlu2 %77  }
  0x7f   :  { %81 = vst.msk [vmem:[#allocation0 + $0xc] sm:$0x1] %vm8_vm0, %v78_v22  }
  0x84   :  { %v30_v23 = vpop.permute.xlu1 %29  }
  0x85   :  { %v18_v24 = vpop.permute.xlu0 %17   ;;  %33 = vst.msk [vmem:[#allocation0 + $0x4] ss:$16 sm:$0x3] %vm8_vm0, %v30_v23  }
  0x86   :  { %21 = vst.msk [vmem:[#allocation0 + $0x2] ss:$16 sm:$0x3] %vm8_vm0, %v18_v24   ;;  %v96_v25 = vpop.permute.xlu2 %95  }
  0x87   :  { %99 = vst.msk [vmem:[#allocation0 + $0xf] sm:$0x1] %vm8_vm0, %v96_v25  }
  0x8c   :  { %v54_v26 = vpop.permute.xlu1 %53  }
  0x8d   :  { %v48_v27 = vpop.permute.xlu0 %47   ;;  %57 = vst.msk [vmem:[#allocation0 + $0x8] sm:$0x1] %vm8_vm0, %v54_v26  }
  0x8e   :  { %51 = vst.msk [vmem:[#allocation0 + $0x7] ss:$16 sm:$0x3] %vm8_vm0, %v48_v27  }
  0x94   :  { %v72_v28 = vpop.permute.xlu1 %71  }
  0x95   :  { %v66_v29 = vpop.permute.xlu0 %65   ;;  %75 = vst.msk [vmem:[#allocation0 + $0xb] sm:$0x1] %vm8_vm0, %v72_v28  }
  0x96   :  { %69 = vst.msk [vmem:[#allocation0 + $0xa] sm:$0x1] %vm8_vm0, %v66_v29  }
  0x9c   :  { %v90_v30 = vpop.permute.xlu1 %89  }
  0x9d   :  { %v84_v31 = vpop.permute.xlu0 %83   ;;  %93 = vst.msk [vmem:[#allocation0 + $0xe] sm:$0x1] %vm8_vm0, %v90_v30  }
  0x9e   :  { %87 = vst.msk [vmem:[#allocation0 + $0xd] sm:$0x1] %vm8_vm0, %v84_v31  }
  0x9f   :  { %108 = dma.vmem_to_hbm [thread:$0]  %s104_s23, 384, %s106_s1, [#allocation1]  }
  0xa0   :  { %152 = dma.done.wait [#allocation1], 384  }
  0xa1   :  { %153 = vsyncadd [#allocation1], 4294966912 }
  0xa2   :  { %111 = vsyncpa [#allocation1], 1 }

// kernel: model_forward.1
= control target key start
LH: loop header
LB: loop body
LE: loop exit
PB: predicated region body
PF: predicated region fallthrough
CT: control target
= control target key end

     0   :  { %8 = vsyncpa [#allocation3], 0  ;;  %s591_s15 = smov [#allocation2]   ;;  %s592_s17 = smov 128   ;;  %s632_s0 = inlined_call_operand.vmem [shape: bf16[1,304], index: 0, kind: input, shape index: {}]   ;;  %s633_s1 = inlined_call_operand.hbm [shape: bf16[304,256], index: 1, kind: input, shape index: {}]   ;;  %s634_s2 = inlined_call_operand.vmem [shape: f32[1,256], index: 2, kind: input, shape index: {}]   ;;  %s635_s3 = inlined_call_operand.vmem [shape: f32[1,256], index: 3, kind: output, shape index: {}]  }
   0x1   :  { %s15_s14 = sshll.u32 %s633_s1, 4  ;;  %s17_s16 = sshll.u32 %s591_s15, 4  ;;  %s16_s14 = int_to_ptr.hbm [resolvable:$true] %s15_s14  ;;  %s18_s16 = int_to_ptr.vmem [resolvable:$true] %s17_s16 }
   0x2   :  { %s593_s18 = smov 8  }
   0x3   :  { %23 = dma.hbm_to_vmem [thread:$0]  %s16_s14, 4864, %s18_s16, [#allocation3], %s592_s17, %s592_s17, %s593_s18  }
   0x4   :  { %589 = dma.done.wait [#allocation3], 4864  }
   0x5   :  { %590 = vsyncadd [#allocation3], 4294962432  ;;  %v428_v0 = vld [vmem:[#allocation2 + $0x70] sm:$0xf]  ;;  %v539_v1 = vld [vmem:[#allocation2 + $0x74] sm:$0xf0] }
   0x6   :  { %v516_v2 = vld [vmem:[#allocation2 + $0x120] sm:$0xf]  ;;  %v429_v3 = vor.u32 %v539_v1, %v428_v0  ;;  %v561_v4 = vld [vmem:[#allocation2 + $0x124] sm:$0xf0]  ;;  %v538_v5 = vld [vmem:[#allocation2 + $0x74] sm:$0xf] }
   0x7   :  { %v430_v6 = vld [vmem:[#allocation2 + $0x78] sm:$0xf0]  ;;  %v517_v7 = vor.u32 %v561_v4, %v516_v2  ;;  %v492_v9 = vld [vmem:[#allocation2 + $0xf0] sm:$0xf]  ;;  %v555_v10 = vld [vmem:[#allocation2 + $0xf4] sm:$0xf0] }
   0x8   :  { %v433_v8 = vor.u32 %v538_v5, %v430_v6  ;;  %v420_v11 = vld [vmem:[#allocation2 + $0x60] sm:$0xf]  ;;  %276 = vmatpush.bf16.msra.mxu0 %v429_v3  ;;  %v493_v12 = vor.u32 %v555_v10, %v492_v9  ;;  %v537_v13 = vld [vmem:[#allocation2 + $0x64] sm:$0xf0]  ;;  %v508_v14 = vld [vmem:[#allocation2 + $0x110] sm:$0xf] }
   0x9   :  { %v559_v15 = vld [vmem:[#allocation2 + $0x114] sm:$0xf0]  ;;  %307 = vmatpush.bf16.msra.mxu2 %v517_v7  ;;  %v421_v16 = vor.u32 %v537_v13, %v420_v11  ;;  %v536_v18 = vld [vmem:[#allocation2 + $0x64] sm:$0xf]  ;;  %v422_v19 = vld [vmem:[#allocation2 + $0x68] sm:$0xf0] }
   0xa   :  { %315 = vmatpush.bf16.msra.mxu3 %v433_v8  ;;  %v509_v17 = vor.u32 %v559_v15, %v508_v14  ;;  %v484_v20 = vld [vmem:[#allocation2 + $0xe0] sm:$0xf]  ;;  %289 = vmatpush.bf16.msra.mxu1 %v493_v12  ;;  %v425_v21 = vor.u32 %v536_v18, %v422_v19  ;;  %v553_v22 = vld [vmem:[#allocation2 + $0xe4] sm:$0xf0]  ;;  %v412_v23 = vld [vmem:[#allocation2 + $0x50] sm:$0xf] }
   0xb   :  { %v535_v24 = vld [vmem:[#allocation2 + $0x54] sm:$0xf0]  ;;  %v485_v25 = vor.u32 %v553_v22, %v484_v20  ;;  %v500_v26 = vld [vmem:[#allocation2 + $0x100] sm:$0xf]  ;;  %v557_v27 = vld [vmem:[#allocation2 + $0x104] sm:$0xf0] }
   0xc   :  { %v534_v28 = vld [vmem:[#allocation2 + $0x54] sm:$0xf]  ;;  %277 = vmatpush.bf16.msra.mxu0 %v421_v16  ;;  %v413_v29 = vor.u32 %v535_v24, %v412_v23  ;;  %v414_v30 = vld [vmem:[#allocation2 + $0x58] sm:$0xf0]  ;;  %v501_v33 = vor.u32 %v557_v27, %v500_v26  ;;  %v476_v35 = vld [vmem:[#allocation2 + $0xd0] sm:$0xf] }
   0xd   :  { %v554_v31 = vld [vmem:[#allocation2 + $0xf4] sm:$0xf]  ;;  %v494_v32 = vld [vmem:[#allocation2 + $0xf8] sm:$0xf0]  ;;  %308 = vmatpush.bf16.msra.mxu2 %v509_v17  ;;  %v417_v34 = vor.u32 %v534_v28, %v414_v30  ;;  %v551_v36 = vld [vmem:[#allocation2 + $0xd4] sm:$0xf0] }
   0xe   :  { %316 = vmatpush.bf16.msra.mxu3 %v425_v21  ;;  %v404_v37 = vld [vmem:[#allocation2 + $0x40] sm:$0xf]  ;;  %290 = vmatpush.bf16.msra.mxu1 %v485_v25  ;;  %v497_v38 = vor.u32 %v554_v31, %v494_v32  ;;  %v477_v39 = vor.u32 %v551_v36, %v476_v35  ;;  %v533_v40 = vld [vmem:[#allocation2 + $0x44] sm:$0xf0]  ;;  %v532_v41 = vld [vmem:[#allocation2 + $0x44] sm:$0xf] }
   0xf   :  { %v406_v42 = vld [vmem:[#allocation2 + $0x48] sm:$0xf0]  ;;  %v552_v43 = vld [vmem:[#allocation2 + $0xe4] sm:$0xf]  ;;  %v468_v45 = vld [vmem:[#allocation2 + $0xc0] sm:$0xf]  ;;  %v405_v46 = vor.u32 %v533_v40, %v404_v37 }
  0x10   :  { %v486_v44 = vld [vmem:[#allocation2 + $0xe8] sm:$0xf0]  ;;  %278 = vmatpush.bf16.msra.mxu0 %v413_v29  ;;  %v549_v47 = vld [vmem:[#allocation2 + $0xc4] sm:$0xf0]  ;;  %v409_v48 = vor.u32 %v532_v41, %v406_v42  ;;  %v396_v49 = vld [vmem:[#allocation2 + $0x30] sm:$0xf] }
  0x11   :  { %309 = vmatpush.bf16.msra.mxu2 %v501_v33  ;;  %v531_v50 = vld [vmem:[#allocation2 + $0x34] sm:$0xf0]  ;;  %v489_v52 = vor.u32 %v552_v43, %v486_v44  ;;  %v469_v53 = vor.u32 %v549_v47, %v468_v45  ;;  %v530_v54 = vld [vmem:[#allocation2 + $0x34] sm:$0xf]  ;;  %v398_v55 = vld [vmem:[#allocation2 + $0x38] sm:$0xf0] }
  0x12   :  { %317 = vmatpush.bf16.msra.mxu3 %v417_v34  ;;  %v31_v51 = vld [vmem:[%s632_s0] sm:$0x7]  ;;  %291 = vmatpush.bf16.msra.mxu1 %v477_v39  ;;  %v460_v56 = vld [vmem:[#allocation2 + $0xb0] sm:$0xf]  ;;  %v397_v58 = vor.u32 %v531_v50, %v396_v49  ;;  %v550_v59 = vld [vmem:[#allocation2 + $0xd4] sm:$0xf]  ;;  %v401_v61 = vor.u32 %v530_v54, %v398_v55 }
  0x13   :  { %72 = vst [vmem:[#allocation1] ss:$9 sm:$0xff] %v31_v51  ;;  %v547_v57 = vld [vmem:[#allocation2 + $0xb4] sm:$0xf0]  ;;  %v478_v60 = vld [vmem:[#allocation2 + $0xd8] sm:$0xf0] }
  0x14   :  { %279 = vmatpush.bf16.msra.mxu0 %v405_v46  ;;  %v388_v62 = vld [vmem:[#allocation2 + $0x20] sm:$0xf]  ;;  %v529_v63 = vld [vmem:[#allocation2 + $0x24] sm:$0xf0]  ;;  %v461_v0 = vor.u32 %v547_v57, %v460_v56  ;;  %v528_v1 = vld [vmem:[#allocation2 + $0x24] sm:$0xf]  ;;  %v481_v3 = vor.u32 %v550_v59, %v478_v60 }
  0x15   :  { %328 = vmatpush.bf16.msrb.mxu2 %v497_v38  ;;  %v390_v2 = vld [vmem:[#allocation2 + $0x28] sm:$0xf0]  ;;  %vm273_vm0 = vcmask 392192   ;;  %v452_v4 = vld [vmem:[#allocation2 + $0xa0] sm:$0xf]  ;;  %v389_v6 = vor.u32 %v529_v63, %v388_v62  ;;  %vm357_vm1 = vcmask 1040384  }
  0x16   :  { %318 = vmatpush.bf16.msra.mxu3 %v409_v48  ;;  %292 = vmatpush.bf16.msra.mxu1 %v469_v53  ;;  %v545_v5 = vld [vmem:[#allocation2 + $0xa4] sm:$0xf0]  ;;  %v548_v7 = vld [vmem:[#allocation2 + $0xc4] sm:$0xf]  ;;  %v470_v8 = vld [vmem:[#allocation2 + $0xc8] sm:$0xf0]  ;;  %v393_v10 = vor.u32 %v528_v1, %v390_v2 }
  0x17   :  { %v380_v11 = vld [vmem:[#allocation2 + $0x10] sm:$0xf]  ;;  %v527_v12 = vld [vmem:[#allocation2 + $0x14] sm:$0xf0]  ;;  %v453_v13 = vor.u32 %v545_v5, %v452_v4  ;;  %v526_v14 = vld [vmem:[#allocation2 + $0x14] sm:$0xf]  ;;  %v473_v16 = vor.u32 %v548_v7, %v470_v8  ;;  %v360_v7 = vlaneseq }
  0x18   :  { %280 = vmatpush.bf16.msra.mxu0 %v397_v58  ;;  %v382_v15 = vld [vmem:[#allocation2 + $0x18] sm:$0xf0]  ;;  %v444_v17 = vld [vmem:[#allocation2 + $0x90] sm:$0xf]  ;;  %v543_v18 = vld [vmem:[#allocation2 + $0x94] sm:$0xf0]  ;;  %v381_v19 = vor.u32 %v527_v12, %v380_v11 }
  0x19   :  { %329 = vmatpush.bf16.msrb.mxu2 %v489_v52  ;;  %v546_v20 = vld [vmem:[#allocation2 + $0xb4] sm:$0xf]  ;;  %v462_v21 = vld [vmem:[#allocation2 + $0xb8] sm:$0xf0]  ;;  %v385_v22 = vor.u32 %v526_v14, %v382_v15  ;;  %v372_v23 = vld [vmem:[#allocation2] sm:$0xf]  ;;  %v445_v26 = vor.u32 %v543_v18, %v444_v17 }
  0x1a   :  { %319 = vmatpush.bf16.msra.mxu3 %v401_v61  ;;  %v620_v9 = vld [vmem:[#allocation1 + $0x12] sm:$0xff]  ;;  %293 = vmatpush.bf16.msra.mxu1 %v461_v0  ;;  %v524_v25 = vld [vmem:[#allocation2 + $0x4] sm:$0xf]  ;;  %v465_v30 = vor.u32 %v546_v20, %v462_v21  ;;  %v436_v31 = vld [vmem:[#allocation2 + $0x80] sm:$0xf]  ;;  %vm362_vm2 = vcmp.lt.s32.totalorder %v360_v7, 256 }
  0x1b   :  { %522 = vmatmul.msk.bf16.vlgmr.msra.gmra.mxu2 %vm273_vm0, %v620_v9  ;;  %v525_v24 = vld [vmem:[#allocation2 + $0x4] sm:$0xf0]  ;;  %v374_v27 = vld [vmem:[#allocation2 + $0x8] sm:$0xf0]  ;;  %v560_v28 = vld [vmem:[#allocation2 + $0x124] sm:$0xf] }
  0x1c   :  { %281 = vmatpush.bf16.msra.mxu0 %v389_v6  ;;  %v518_v29 = vld [vmem:[#allocation2 + $0x128] sm:$0xf0]  ;;  %v541_v32 = vld [vmem:[#allocation2 + $0x84] sm:$0xf0]  ;;  %v373_v33 = vor.u32 %v525_v24, %v372_v23  ;;  %v544_v34 = vld [vmem:[#allocation2 + $0xa4] sm:$0xf]  ;;  %v377_v36 = vor.u32 %v524_v25, %v374_v27 }
  0x1d   :  { %330 = vmatpush.bf16.msrb.mxu2 %v481_v3  ;;  %v454_v35 = vld [vmem:[#allocation2 + $0xa8] sm:$0xf0]  ;;  %v521_v37 = vor.u32 %v560_v28, %v518_v29  ;;  %v437_v38 = vor.u32 %v541_v32, %v436_v31  ;;  %v558_v39 = vld [vmem:[#allocation2 + $0x114] sm:$0xf]  ;;  %v510_v40 = vld [vmem:[#allocation2 + $0x118] sm:$0xf0] }
  0x1e   :  { %320 = vmatpush.bf16.msra.mxu3 %v393_v10  ;;  %294 = vmatpush.bf16.msra.mxu1 %v453_v13  ;;  %v457_v41 = vor.u32 %v544_v34, %v454_v35  ;;  %v73_v42 = vld [vmem:[#allocation1] sm:$0xff]  ;;  %v542_v43 = vld [vmem:[#allocation2 + $0x94] sm:$0xf]  ;;  %v513_v45 = vor.u32 %v558_v39, %v510_v40  ;;  %v74_v46 = vld [vmem:[#allocation1 + $0x9] sm:$0xff] }
  0x1f   :  { %v446_v44 = vld [vmem:[#allocation2 + $0x98] sm:$0xf0]  ;;  %v556_v47 = vld [vmem:[#allocation2 + $0x104] sm:$0xf]  ;;  %v502_v48 = vld [vmem:[#allocation2 + $0x108] sm:$0xf0] }
  0x20   :  { %282 = vmatpush.bf16.msra.mxu0 %v381_v19  ;;  %v449_v49 = vor.u32 %v542_v43, %v446_v44  ;;  %v540_v50 = vld [vmem:[#allocation2 + $0x84] sm:$0xf]  ;;  %v438_v51 = vld [vmem:[#allocation2 + $0x88] sm:$0xf0]  ;;  %v505_v52 = vor.u32 %v556_v47, %v502_v48  ;;  %v70_v58 = vld [vmem:[%s634_s2] sm:$0x3] }
  0x21   :  { %331 = vmatpush.bf16.msrb.mxu2 %v473_v16  ;;  %v441_v53 = vor.u32 %v540_v50, %v438_v51  ;;  %v269_v61 = vperm.slane %v70_v58, 0  ;;  %v270_v62 = vperm.slane %v70_v58, 1 }
  0x22   :  { %321 = vmatpush.bf16.msra.mxu3 %v385_v22  ;;  %295 = vmatpush.bf16.msra.mxu1 %v445_v26 }
  0x24   :  { %283 = vmatpush.bf16.msra.mxu0 %v373_v33 }
  0x25   :  { %332 = vmatpush.bf16.msrb.mxu2 %v465_v30 }
  0x26   :  { %322 = vmatpush.bf16.msra.mxu3 %v377_v36  ;;  %296 = vmatpush.bf16.msra.mxu1 %v437_v38 }
  0x27   :  { %284 = vmatmul.bf16.vlgmr.msra.gmra.mxu0 %v73_v42 }
  0x28   :  { %346 = vmatpush.bf16.msrb.mxu0 %v521_v37 }
  0x29   :  { %333 = vmatpush.bf16.msrb.mxu2 %v457_v41  ;;  %323 = vmatmul.bf16.vlgmr.msra.gmra.mxu3 %v73_v42 }
  0x2a   :  { %297 = vmatmul.bf16.vlgmr.msra.gmra.mxu1 %v74_v46 }
  0x2c   :  { %347 = vmatpush.bf16.msrb.mxu0 %v513_v45 }
  0x2d   :  { %334 = vmatpush.bf16.msrb.mxu2 %v449_v49 }
  0x30   :  { %348 = vmatpush.bf16.msrb.mxu0 %v505_v52 }
  0x31   :  { %335 = vmatpush.bf16.msrb.mxu2 %v441_v53 }
  0x34   :  { %336 = vmatmul.bf16.vlgmr.msrb.gmra.mxu2 %v74_v46 }
  0x37   :  { %523 = vmatmul.msk.bf16.vlgmr.msrb.gmra.mxu0 %vm273_vm0, %v620_v9 }
  0x9e   :  { %v311_v54 = vpop.f32.mrf.mxu2 }
  0xa4   :  { %v285_v55 = vpop.f32.mrf.mxu0 }
  0xa5   :  { %v286_v0 = vadd.f32 %v285_v55, %v269_v61 }
  0xa6   :  { %v313_v56 = vpop.f32.mrf.mxu2 }
  0xa7   :  { %v298_v57 = vpop.f32.mrf.mxu1 }
  0xa8   :  { %v299_v5 = vadd.f32 %v298_v57, %v286_v0 }
  0xaa   :  { %v312_v9 = vadd.f32 %v311_v54, %v299_v5 }
  0xac   :  { %v324_v59 = vpop.f32.mrf.mxu3  ;;  %v287_v60 = vpop.f32.mrf.mxu0 }
  0xad   :  { %v325_v1 = vadd.f32 %v324_v59, %v270_v62 }
  0xaf   :  { %v300_v63 = vpop.f32.mrf.mxu1 }
  0xb4   :  { %v326_v2 = vpop.f32.mrf.mxu3  ;;  %v350_v3 = vpop.f32.mrf.mxu0 }
  0xb7   :  { %v337_v4 = vpop.f32.mrf.mxu2 }
  0xb8   :  { %v338_v6 = vadd.f32 %v337_v4, %v325_v1 }
  0xba   :  { %v351_v8 = vadd.f32 %v350_v3, %v338_v6 }
  0xbc   :  { %v356_v10 = vrot.slane %v351_v8, 7  ;;  %v352_v12 = vpop.f32.mrf.mxu0 }
  0xbe   :  { %v358_v11 = vsel %vm357_vm1, %v312_v9, %v356_v10 }
  0xbf   :  { %364 = vst.msk [vmem:[%s635_s3] sm:$0x3] %vm362_vm2, %v358_v11  ;;  %v339_v13 = vpop.f32.mrf.mxu2 }
  0xc0   :  { %369 = vsyncpa [#allocation3], 1 }

</bundles_post_ra>
